<compile_context>
chip_gen: v5e
topology: v5e:2x2
jax: 0.10.0
libtpu: 0.0.40
codegen_flags: <defaults>
</compile_context>

<pallas_src>
import math

import jax
import jax.numpy as jnp
from jax.experimental import pallas as pl
from jax.experimental.pallas import tpu as pltpu

LANE = 128      # vreg lane width (last dim)
SUBLANE = 8     # vreg sublane count (second-to-last dim)


def _round_up(x, m):
    return ((x + m - 1) // m) * m


def _cdiv(a, b):
    return -(-a // b)


# ----------------------------------------------------------------------------
# Kernel
# ----------------------------------------------------------------------------
def mapping_mlp_kernel(z_ref,
                       w1_ref, b1_ref,
                       w2_ref, b2_ref,
                       w3_ref, b3_ref,
                       w4f_ref, b4f_ref,
                       w4p_ref, b4p_ref,
                       freq_ref, phase_ref):
    """One batch tile per grid step: 4 MXU matmuls (bf16 in, f32 acc) + f32 VPU leaky-relu.
    The last layer is split into two matmuls (frequencies / phase_shifts) so both outputs
    are written directly at their true width."""

    def layer(x_bf16, w_ref, b_ref):
        h = jnp.dot(x_bf16, w_ref[...], preferred_element_type=jnp.float32)
        h = h + b_ref[...]                       # bias add in f32
        return jnp.where(h > 0, h, 0.2 * h)      # LeakyReLU(0.2) in f32

    x = z_ref[...].astype(jnp.bfloat16)          # in-kernel cast (VPU, free under DMA/MXU)
    h = layer(x, w1_ref, b1_ref)
    h = layer(h.astype(jnp.bfloat16), w2_ref, b2_ref)
    h = layer(h.astype(jnp.bfloat16), w3_ref, b3_ref)

    h_bf = h.astype(jnp.bfloat16)
    f = jnp.dot(h_bf, w4f_ref[...], preferred_element_type=jnp.float32) + b4f_ref[...]
    p = jnp.dot(h_bf, w4p_ref[...], preferred_element_type=jnp.float32) + b4p_ref[...]
    freq_ref[...] = f.astype(freq_ref.dtype)
    phase_ref[...] = p.astype(phase_ref.dtype)


# ----------------------------------------------------------------------------
# Parameter prep (hidden-dim lane padding, last-layer split, bf16 cast of weights)
# ----------------------------------------------------------------------------
def prep_params_for_kernel(params):
    """Zero-pad the hidden dim to a multiple of 128 lanes, split the last layer into
    frequency / phase halves; weights -> bf16, biases -> f32."""
    z_dim, hidden = params["w1"].shape
    d_out = params["w4"].shape[1]
    half = d_out // 2
    h_p = _round_up(hidden, LANE)

    kp = {}
    # Layer 1: (z_dim, h_p)  (fan_in left unpadded; z is fed unpadded)
    w1 = jnp.zeros((z_dim, h_p), jnp.float32).at[:, :hidden].set(params["w1"])
    b1 = jnp.zeros((1, h_p), jnp.float32).at[:, :hidden].set(params["b1"])
    kp["w1"] = w1.astype(jnp.bfloat16)
    kp["b1"] = b1
    # Layers 2, 3: (h_p, h_p)
    for i in (2, 3):
        w = jnp.zeros((h_p, h_p), jnp.float32).at[:hidden, :hidden].set(params[f"w{i}"])
        b = jnp.zeros((1, h_p), jnp.float32).at[:, :hidden].set(params[f"b{i}"])
        kp[f"w{i}"] = w.astype(jnp.bfloat16)
        kp[f"b{i}"] = b
    # Layer 4, split into the two output halves: (h_p, half) each
    w4, b4 = params["w4"], params["b4"]
    w4f = jnp.zeros((h_p, half), jnp.float32).at[:hidden, :].set(w4[:, :half])
    w4p = jnp.zeros((h_p, half), jnp.float32).at[:hidden, :].set(w4[:, half:])
    kp["w4f"] = w4f.astype(jnp.bfloat16)
    kp["b4f"] = b4[:, :half].astype(jnp.float32)
    kp["w4p"] = w4p.astype(jnp.bfloat16)
    kp["b4p"] = b4[:, half:].astype(jnp.float32)
    return kp


# ----------------------------------------------------------------------------
# Forward wrapper
# ----------------------------------------------------------------------------
def mapping_network_forward(z, params, kernel_params=None, *, target_tile_b=2048):
    """Runs the Pallas kernel; returns (frequencies, phase_shifts) directly (no glue passes)."""
    B, z_dim = z.shape
    d_out = params["w4"].shape[1]
    half = d_out // 2
    if kernel_params is None:
        kernel_params = prep_params_for_kernel(params)
    kp = kernel_params
    h_p = kp["w2"].shape[0]                      # padded hidden width

    # Adaptive batch tiling: ~target_tile_b rows per tile, padding capped to a few rows per
    # tile; for large batches force >= 2 tiles so v7x's two TensorCores both get work.
    num_tiles = max(1, _cdiv(B, target_tile_b))
    if num_tiles == 1 and B >= 1024:
        num_tiles = 2
    tile_b = _round_up(_cdiv(B, num_tiles), SUBLANE)
    grid = (_cdiv(B, tile_b),)

    batch_map = lambda i: (i, 0)   # tiled over batch
    const_map = lambda i: (0, 0)   # weights/biases resident (same block every step)

    in_specs = [pl.BlockSpec((tile_b, z_dim), batch_map)]
    weight_order = ("w1", "b1", "w2", "b2", "w3", "b3", "w4f", "b4f", "w4p", "b4p")
    for name in weight_order:
        in_specs.append(pl.BlockSpec(kp[name].shape, const_map))
    out_specs = [pl.BlockSpec((tile_b, half), batch_map),
                 pl.BlockSpec((tile_b, half), batch_map)]
    out_shape = (jax.ShapeDtypeStruct((B, half), jnp.float32),
                 jax.ShapeDtypeStruct((B, half), jnp.float32))

    flops = 2 * B * (z_dim * h_p + 2 * h_p * h_p + h_p * d_out)
    bytes_accessed = (
        B * z_dim * 4                                    # f32 z in
        + 2 * B * half * 4                               # two f32 outputs
        + sum(kp[n].size * (2 if n.startswith("w") else 4) for n in weight_order)
    )

    f = pl.pallas_call(
        mapping_mlp_kernel,
        out_shape=out_shape,
        grid_spec=pltpu.PrefetchScalarGridSpec(
            num_scalar_prefetch=0,
            grid=grid,
            in_specs=in_specs,
            out_specs=out_specs,
        ),
        compiler_params=pltpu.CompilerParams(
            dimension_semantics=("parallel",),           # shards batch tiles across TCs on v7x
            vmem_limit_bytes=32 * 1024 * 1024,           # safe ceiling on v5e/v6e/v7x
        ),
        cost_estimate=pl.CostEstimate(
            flops=flops, transcendentals=0, bytes_accessed=bytes_accessed),
    )
    freqs, phases = f(z,
                      kp["w1"], kp["b1"],
                      kp["w2"], kp["b2"],
                      kp["w3"], kp["b3"],
                      kp["w4f"], kp["b4f"],
                      kp["w4p"], kp["b4p"])
    return freqs, phases


# ----------------------------------------------------------------------------
# Init matching the PyTorch module
# ----------------------------------------------------------------------------
def init_params(key, z_dim, map_hidden_dim, map_output_dim):
    """kaiming_normal_(a=0.2, fan_in, leaky_relu) weights, default nn.Linear bias init,
       last-layer weight scaled by 0.25.  Master params kept in f32."""
    dims = [(z_dim, map_hidden_dim),
            (map_hidden_dim, map_hidden_dim),
            (map_hidden_dim, map_hidden_dim),
            (map_hidden_dim, map_output_dim)]
    gain = math.sqrt(2.0 / (1.0 + 0.2 ** 2))  # leaky_relu gain with a=0.2
    params = {}
    keys = jax.random.split(key, 2 * len(dims))
    for i, (fan_in, fan_out) in enumerate(dims):
        wk, bk = keys[2 * i], keys[2 * i + 1]
        std = gain / math.sqrt(fan_in)
        w = std * jax.random.normal(wk, (fan_in, fan_out), dtype=jnp.float32)
        if i == len(dims) - 1:
            w = w * 0.25
        bound = 1.0 / math.sqrt(fan_in)
        b = jax.random.uniform(bk, (1, fan_out), dtype=jnp.float32,
                               minval=-bound, maxval=bound)
        params[f"w{i + 1}"] = w
        params[f"b{i + 1}"] = b
    return params


# ----------------------------------------------------------------------------
# Pure-JAX references
# ----------------------------------------------------------------------------
def reference_forward(z, params, *, dot_dtype=jnp.float32):
    """Pure-JAX reference. dot_dtype=bfloat16 mirrors the kernel's MXU operand precision."""
    def leaky_relu(x):
        return jnp.where(x > 0, x, 0.2 * x)

    def dot(a, w):
        return jnp.dot(a.astype(dot_dtype), w.astype(dot_dtype),
                       preferred_element_type=jnp.float32)

    h = leaky_relu(dot(z, params["w1"]) + params["b1"])
    h = leaky_relu(dot(h, params["w2"]) + params["b2"])
    h = leaky_relu(dot(h, params["w3"]) + params["b3"])
    out = dot(h, params["w4"]) + params["b4"]
    half = out.shape[-1] // 2
    return out[..., :half], out[..., half:]


if __name__ == "__main__":
    # Small shapes consistent with the module: batch=8, z_dim=32, hidden=64, output=64.
    B, Z_DIM, HIDDEN, OUT = 8, 32, 64, 64

    key = jax.random.PRNGKey(0)
    pkey, zkey = jax.random.split(key)
    params = init_params(pkey, Z_DIM, HIDDEN, OUT)
    z = jax.random.normal(zkey, (B, Z_DIM), dtype=jnp.float32)

    freqs, phases = mapping_network_forward(z, params)
    freqs = jax.block_until_ready(freqs)
    phases = jax.block_until_ready(phases)

    assert freqs.shape == (B, OUT // 2) and phases.shape == (B, OUT // 2)

    # Tight check against a bf16-operand reference (same MXU precision as the kernel).
    ref_f_bf, ref_p_bf = reference_forward(z, params, dot_dtype=jnp.bfloat16)
    assert jnp.allclose(freqs, ref_f_bf, atol=2e-3, rtol=2e-3)
    assert jnp.allclose(phases, ref_p_bf, atol=2e-3, rtol=2e-3)

    # Loose check against the full-f32 reference (== PyTorch module semantics).
    ref_f, ref_p = reference_forward(z, params)
    assert jnp.allclose(freqs, ref_f, atol=5e-2, rtol=5e-2)
    assert jnp.allclose(phases, ref_p, atol=5e-2, rtol=5e-2)

    print("KERNEL_OK")
</pallas_src>

<mosaic_0001>
module attributes {stable_mosaic.version = 11 : i64} {
  func.func @mapping_mlp_kernel(%arg0: i32, %arg1: memref<8x32xf32, #tpu.memory_space<vmem>>, %arg2: memref<32x128xbf16, #tpu.memory_space<vmem>>, %arg3: memref<1x128xf32, #tpu.memory_space<vmem>>, %arg4: memref<128x128xbf16, #tpu.memory_space<vmem>>, %arg5: memref<1x128xf32, #tpu.memory_space<vmem>>, %arg6: memref<128x128xbf16, #tpu.memory_space<vmem>>, %arg7: memref<1x128xf32, #tpu.memory_space<vmem>>, %arg8: memref<128x32xbf16, #tpu.memory_space<vmem>>, %arg9: memref<1x32xf32, #tpu.memory_space<vmem>>, %arg10: memref<128x32xbf16, #tpu.memory_space<vmem>>, %arg11: memref<1x32xf32, #tpu.memory_space<vmem>>, %arg12: memref<8x32xf32, #tpu.memory_space<vmem>>, %arg13: memref<8x32xf32, #tpu.memory_space<vmem>>) attributes {dimension_semantics = [#tpu.dimension_semantics<parallel>], iteration_bounds = array<i64: 1>, scalar_prefetch = 0 : i64, scratch_operands = 0 : i64, tpu.core_type = #tpu.core_type<tc>, window_params = [{transform_indices = @transform_0, window_bounds = array<i64: 8, 32>}, {pipeline_mode = #tpu.pipeline_mode<synchronous>, transform_indices = @transform_1, window_bounds = array<i64: 32, 128>}, {pipeline_mode = #tpu.pipeline_mode<synchronous>, transform_indices = @transform_2, window_bounds = array<i64: 1, 128>}, {pipeline_mode = #tpu.pipeline_mode<synchronous>, transform_indices = @transform_3, window_bounds = array<i64: 128, 128>}, {pipeline_mode = #tpu.pipeline_mode<synchronous>, transform_indices = @transform_4, window_bounds = array<i64: 1, 128>}, {pipeline_mode = #tpu.pipeline_mode<synchronous>, transform_indices = @transform_5, window_bounds = array<i64: 128, 128>}, {pipeline_mode = #tpu.pipeline_mode<synchronous>, transform_indices = @transform_6, window_bounds = array<i64: 1, 128>}, {pipeline_mode = #tpu.pipeline_mode<synchronous>, transform_indices = @transform_7, window_bounds = array<i64: 128, 32>}, {pipeline_mode = #tpu.pipeline_mode<synchronous>, transform_indices = @transform_8, window_bounds = array<i64: 1, 32>}, {pipeline_mode = #tpu.pipeline_mode<synchronous>, transform_indices = @transform_9, window_bounds = array<i64: 128, 32>}, {pipeline_mode = #tpu.pipeline_mode<synchronous>, transform_indices = @transform_10, window_bounds = array<i64: 1, 32>}, {transform_indices = @transform_11, window_bounds = array<i64: 8, 32>}, {transform_indices = @transform_12, window_bounds = array<i64: 8, 32>}]} {
    %c0 = arith.constant 0 : index
    %c0_0 = arith.constant 0 : index
    %0 = vector.load %arg1[%c0, %c0_0] : memref<8x32xf32, #tpu.memory_space<vmem>>, vector<8x32xf32>
    %1 = arith.truncf %0 : vector<8x32xf32> to vector<8x32xbf16>
    %c0_1 = arith.constant 0 : index
    %c0_2 = arith.constant 0 : index
    %2 = vector.load %arg2[%c0_1, %c0_2] : memref<32x128xbf16, #tpu.memory_space<vmem>>, vector<32x128xbf16>
    %cst = arith.constant dense<0.000000e+00> : vector<8x128xf32>
    %3 = tpu.matmul %1, %2, %cst {dimension_numbers = #tpu.dot_dimension_numbers<[1], [0], [0], [1], [0, 0, 1, 1], [], []>} : vector<8x32xbf16>, vector<32x128xbf16>, vector<8x128xf32> -> vector<8x128xf32>
    %c0_3 = arith.constant 0 : index
    %c0_4 = arith.constant 0 : index
    %4 = vector.load %arg3[%c0_3, %c0_4] : memref<1x128xf32, #tpu.memory_space<vmem>>, vector<1x128xf32>
    %5 = vector.broadcast %4 : vector<1x128xf32> to vector<8x128xf32>
    %6 = arith.addf %3, %5 : vector<8x128xf32>
    %cst_5 = arith.constant 0.000000e+00 : f32
    %7 = vector.broadcast %cst_5 : f32 to vector<8x128xf32>
    %8 = arith.cmpf ogt, %6, %7 : vector<8x128xf32>
    %cst_6 = arith.constant 2.000000e-01 : f32
    %9 = vector.broadcast %cst_6 : f32 to vector<8x128xf32>
    %10 = arith.mulf %9, %6 : vector<8x128xf32>
    %11 = arith.select %8, %6, %10 : vector<8x128xi1>, vector<8x128xf32>
    %12 = arith.truncf %11 : vector<8x128xf32> to vector<8x128xbf16>
    %c0_7 = arith.constant 0 : index
    %c0_8 = arith.constant 0 : index
    %13 = vector.load %arg4[%c0_7, %c0_8] : memref<128x128xbf16, #tpu.memory_space<vmem>>, vector<128x128xbf16>
    %cst_9 = arith.constant dense<0.000000e+00> : vector<8x128xf32>
    %14 = tpu.matmul %12, %13, %cst_9 {dimension_numbers = #tpu.dot_dimension_numbers<[1], [0], [0], [1], [0, 0, 1, 1], [], []>} : vector<8x128xbf16>, vector<128x128xbf16>, vector<8x128xf32> -> vector<8x128xf32>
    %c0_10 = arith.constant 0 : index
    %c0_11 = arith.constant 0 : index
    %15 = vector.load %arg5[%c0_10, %c0_11] : memref<1x128xf32, #tpu.memory_space<vmem>>, vector<1x128xf32>
    %16 = vector.broadcast %15 : vector<1x128xf32> to vector<8x128xf32>
    %17 = arith.addf %14, %16 : vector<8x128xf32>
    %cst_12 = arith.constant 0.000000e+00 : f32
    %18 = vector.broadcast %cst_12 : f32 to vector<8x128xf32>
    %19 = arith.cmpf ogt, %17, %18 : vector<8x128xf32>
    %cst_13 = arith.constant 2.000000e-01 : f32
    %20 = vector.broadcast %cst_13 : f32 to vector<8x128xf32>
    %21 = arith.mulf %20, %17 : vector<8x128xf32>
    %22 = arith.select %19, %17, %21 : vector<8x128xi1>, vector<8x128xf32>
    %23 = arith.truncf %22 : vector<8x128xf32> to vector<8x128xbf16>
    %c0_14 = arith.constant 0 : index
    %c0_15 = arith.constant 0 : index
    %24 = vector.load %arg6[%c0_14, %c0_15] : memref<128x128xbf16, #tpu.memory_space<vmem>>, vector<128x128xbf16>
    %cst_16 = arith.constant dense<0.000000e+00> : vector<8x128xf32>
    %25 = tpu.matmul %23, %24, %cst_16 {dimension_numbers = #tpu.dot_dimension_numbers<[1], [0], [0], [1], [0, 0, 1, 1], [], []>} : vector<8x128xbf16>, vector<128x128xbf16>, vector<8x128xf32> -> vector<8x128xf32>
    %c0_17 = arith.constant 0 : index
    %c0_18 = arith.constant 0 : index
    %26 = vector.load %arg7[%c0_17, %c0_18] : memref<1x128xf32, #tpu.memory_space<vmem>>, vector<1x128xf32>
    %27 = vector.broadcast %26 : vector<1x128xf32> to vector<8x128xf32>
    %28 = arith.addf %25, %27 : vector<8x128xf32>
    %cst_19 = arith.constant 0.000000e+00 : f32
    %29 = vector.broadcast %cst_19 : f32 to vector<8x128xf32>
    %30 = arith.cmpf ogt, %28, %29 : vector<8x128xf32>
    %cst_20 = arith.constant 2.000000e-01 : f32
    %31 = vector.broadcast %cst_20 : f32 to vector<8x128xf32>
    %32 = arith.mulf %31, %28 : vector<8x128xf32>
    %33 = arith.select %30, %28, %32 : vector<8x128xi1>, vector<8x128xf32>
    %34 = arith.truncf %33 : vector<8x128xf32> to vector<8x128xbf16>
    %c0_21 = arith.constant 0 : index
    %c0_22 = arith.constant 0 : index
    %35 = vector.load %arg8[%c0_21, %c0_22] : memref<128x32xbf16, #tpu.memory_space<vmem>>, vector<128x32xbf16>
    %cst_23 = arith.constant dense<0.000000e+00> : vector<8x32xf32>
    %36 = tpu.matmul %34, %35, %cst_23 {dimension_numbers = #tpu.dot_dimension_numbers<[1], [0], [0], [1], [0, 0, 1, 1], [], []>} : vector<8x128xbf16>, vector<128x32xbf16>, vector<8x32xf32> -> vector<8x32xf32>
    %c0_24 = arith.constant 0 : index
    %c0_25 = arith.constant 0 : index
    %37 = vector.load %arg9[%c0_24, %c0_25] : memref<1x32xf32, #tpu.memory_space<vmem>>, vector<1x32xf32>
    %38 = vector.broadcast %37 : vector<1x32xf32> to vector<8x32xf32>
    %39 = arith.addf %36, %38 : vector<8x32xf32>
    %c0_26 = arith.constant 0 : index
    %c0_27 = arith.constant 0 : index
    %40 = vector.load %arg10[%c0_26, %c0_27] : memref<128x32xbf16, #tpu.memory_space<vmem>>, vector<128x32xbf16>
    %cst_28 = arith.constant dense<0.000000e+00> : vector<8x32xf32>
    %41 = tpu.matmul %34, %40, %cst_28 {dimension_numbers = #tpu.dot_dimension_numbers<[1], [0], [0], [1], [0, 0, 1, 1], [], []>} : vector<8x128xbf16>, vector<128x32xbf16>, vector<8x32xf32> -> vector<8x32xf32>
    %c0_29 = arith.constant 0 : index
    %c0_30 = arith.constant 0 : index
    %42 = vector.load %arg11[%c0_29, %c0_30] : memref<1x32xf32, #tpu.memory_space<vmem>>, vector<1x32xf32>
    %43 = vector.broadcast %42 : vector<1x32xf32> to vector<8x32xf32>
    %44 = arith.addf %41, %43 : vector<8x32xf32>
    %c0_31 = arith.constant 0 : index
    %c0_32 = arith.constant 0 : index
    %45 = vector.load %arg12[%c0_31, %c0_32] : memref<8x32xf32, #tpu.memory_space<vmem>>, vector<8x32xf32>
    tpu.vector_store %arg12[%c0_31, %c0_32], %39 {strides = array<i32>} : memref<8x32xf32, #tpu.memory_space<vmem>>, vector<8x32xf32>,
    %c0_33 = arith.constant 0 : index
    %c0_34 = arith.constant 0 : index
    %46 = vector.load %arg13[%c0_33, %c0_34] : memref<8x32xf32, #tpu.memory_space<vmem>>, vector<8x32xf32>
    tpu.vector_store %arg13[%c0_33, %c0_34], %44 {strides = array<i32>} : memref<8x32xf32, #tpu.memory_space<vmem>>, vector<8x32xf32>,
    return
  }
  func.func @transform_0(%arg0: i32) -> (i32, i32) {
    %c0_i32 = arith.constant 0 : i32
    %c0_i32_0 = arith.constant 0 : i32
    return %arg0, %c0_i32 : i32, i32
  }
  func.func @transform_1(%arg0: i32) -> (i32, i32) {
    %c0_i32 = arith.constant 0 : i32
    %c0_i32_0 = arith.constant 0 : i32
    %c0_i32_1 = arith.constant 0 : i32
    return %c0_i32, %c0_i32_0 : i32, i32
  }
  func.func @transform_2(%arg0: i32) -> (i32, i32) {
    %c0_i32 = arith.constant 0 : i32
    %c0_i32_0 = arith.constant 0 : i32
    %c0_i32_1 = arith.constant 0 : i32
    return %c0_i32, %c0_i32_0 : i32, i32
  }
  func.func @transform_3(%arg0: i32) -> (i32, i32) {
    %c0_i32 = arith.constant 0 : i32
    %c0_i32_0 = arith.constant 0 : i32
    %c0_i32_1 = arith.constant 0 : i32
    return %c0_i32, %c0_i32_0 : i32, i32
  }
  func.func @transform_4(%arg0: i32) -> (i32, i32) {
    %c0_i32 = arith.constant 0 : i32
    %c0_i32_0 = arith.constant 0 : i32
    %c0_i32_1 = arith.constant 0 : i32
    return %c0_i32, %c0_i32_0 : i32, i32
  }
  func.func @transform_5(%arg0: i32) -> (i32, i32) {
    %c0_i32 = arith.constant 0 : i32
    %c0_i32_0 = arith.constant 0 : i32
    %c0_i32_1 = arith.constant 0 : i32
    return %c0_i32, %c0_i32_0 : i32, i32
  }
  func.func @transform_6(%arg0: i32) -> (i32, i32) {
    %c0_i32 = arith.constant 0 : i32
    %c0_i32_0 = arith.constant 0 : i32
    %c0_i32_1 = arith.constant 0 : i32
    return %c0_i32, %c0_i32_0 : i32, i32
  }
  func.func @transform_7(%arg0: i32) -> (i32, i32) {
    %c0_i32 = arith.constant 0 : i32
    %c0_i32_0 = arith.constant 0 : i32
    %c0_i32_1 = arith.constant 0 : i32
    return %c0_i32, %c0_i32_0 : i32, i32
  }
  func.func @transform_8(%arg0: i32) -> (i32, i32) {
    %c0_i32 = arith.constant 0 : i32
    %c0_i32_0 = arith.constant 0 : i32
    %c0_i32_1 = arith.constant 0 : i32
    return %c0_i32, %c0_i32_0 : i32, i32
  }
  func.func @transform_9(%arg0: i32) -> (i32, i32) {
    %c0_i32 = arith.constant 0 : i32
    %c0_i32_0 = arith.constant 0 : i32
    %c0_i32_1 = arith.constant 0 : i32
    return %c0_i32, %c0_i32_0 : i32, i32
  }
  func.func @transform_10(%arg0: i32) -> (i32, i32) {
    %c0_i32 = arith.constant 0 : i32
    %c0_i32_0 = arith.constant 0 : i32
    %c0_i32_1 = arith.constant 0 : i32
    return %c0_i32, %c0_i32_0 : i32, i32
  }
  func.func @transform_11(%arg0: i32) -> (i32, i32) {
    %c0_i32 = arith.constant 0 : i32
    %c0_i32_0 = arith.constant 0 : i32
    return %arg0, %c0_i32 : i32, i32
  }
  func.func @transform_12(%arg0: i32) -> (i32, i32) {
    %c0_i32 = arith.constant 0 : i32
    %c0_i32_0 = arith.constant 0 : i32
    return %arg0, %c0_i32 : i32, i32
  }
}

</mosaic_0001>

<bundles_post_ra>
// kernel: tpu_custom_call.1
= control target key start
LH: loop header
LB: loop body
LE: loop exit
PB: predicated region body
PF: predicated region fallthrough
CT: control target
= control target key end

     0   :  { %18 = vsyncpa [#allocation3], 0  ;;  %s921_s0 = inlined_call_operand.hbm [shape: f32[8,32], index: 0, kind: input, shape index: {}]   ;;  %s922_s1 = inlined_call_operand.vmem [shape: bf16[32,128], index: 1, kind: input, shape index: {}]   ;;  %s923_s2 = inlined_call_operand.vmem [shape: f32[1,128], index: 2, kind: input, shape index: {}]   ;;  %s924_s3 = inlined_call_operand.vmem [shape: bf16[128,128], index: 3, kind: input, shape index: {}]   ;;  %s925_s4 = inlined_call_operand.vmem [shape: f32[1,128], index: 4, kind: input, shape index: {}]   ;;  %s926_s5 = inlined_call_operand.vmem [shape: bf16[128,128], index: 5, kind: input, shape index: {}]   ;;  %s927_s6 = inlined_call_operand.vmem [shape: f32[1,128], index: 6, kind: input, shape index: {}]   ;;  %s928_s7 = inlined_call_operand.vmem [shape: bf16[128,32], index: 7, kind: input, shape index: {}]   ;;  %s929_s8 = inlined_call_operand.vmem [shape: f32[1,32], index: 8, kind: input, shape index: {}]   ;;  %s930_s9 = inlined_call_operand.vmem [shape: bf16[128,32], index: 9, kind: input, shape index: {}]   ;;  %s931_s10 = inlined_call_operand.vmem [shape: f32[1,32], index: 10, kind: input, shape index: {}]   ;;  %s932_s11 = inlined_call_operand.hbm [shape: f32[8,32], index: 11, kind: output, shape index: {0}]   ;;  %s933_s12 = inlined_call_operand.hbm [shape: f32[8,32], index: 12, kind: output, shape index: {1}]  }
   0x1   :  { %19 = vsyncpa [#allocation4], 0 }
   0x2   :  { %20 = vsyncpa [#allocation7], 0  ;;  %s26_s23 = sshll.u32 %s921_s0, 4  ;;  %s724_s24 = smov [#allocation2]   ;;  %s27_s23 = int_to_ptr.hbm [resolvable:$true] %s26_s23 }
   0x3   :  { %s28_s25 = sshll.u32 %s724_s24, 4  ;;  %s29_s25 = int_to_ptr.vmem [resolvable:$true] %s28_s25 }
   0x4   :  { %31 = dma.hbm_to_vmem [thread:$0]  %s27_s23, 128, %s29_s25, [#allocation3]  }
   0x5   :  { %718 = dma.done.wait [#allocation3], 128  }
   0x6   :  { %719 = vsyncadd [#allocation3], 4294967168  ;;  %v605_v0 = vld [vmem:[%s922_s1 + $0x8] sm:$0xff]  ;;  %v613_v1 = vld [vmem:[%s924_s3 + $0x38] sm:$0xff]  ;;  %vm79_vm0 = vcmask 261120   ;;  %s452_s17 = sshll.u32 %s933_s12, 4  ;;  %s453_s17 = int_to_ptr.hbm [resolvable:$true] %s452_s17 }
   0x7   :  { %89 = vmatpush.bf16.msra.mxu0 %v605_v0  ;;  %v604_v2 = vld [vmem:[%s922_s1] sm:$0xff]  ;;  %168 = vmatpush.bf16.msra.mxu1 %v613_v1  ;;  %v612_v4 = vld [vmem:[%s924_s3 + $0x30] sm:$0xff]  ;;  %v611_v6 = vld [vmem:[%s924_s3 + $0x28] sm:$0xff]  ;;  %s726_s1 = smov [#allocation5]   ;;  %s441_s21 = sshll.u32 %s932_s11, 4  ;;  %s442_s21 = int_to_ptr.hbm [resolvable:$true] %s441_s21 }
   0x8   :  { %v57_v3 = vld [vmem:[#allocation2] sm:$0xff]  ;;  %v609_v8 = vld [vmem:[%s924_s3 + $0x18] sm:$0xff]  ;;  %v608_v9 = vld [vmem:[%s924_s3 + $0x10] sm:$0xff]  ;;  %s439_s19 = sshll.u32 %s726_s1, 4  ;;  %s440_s19 = int_to_ptr.vmem [resolvable:$true] %s439_s19 }
   0x9   :  { %v58_v5 = vpack.c.bf16 %v57_v3, %v57_v3  ;;  %v610_v7 = vld [vmem:[%s924_s3 + $0x20] sm:$0xff]  ;;  %v607_v10 = vld [vmem:[%s924_s3 + $0x8] sm:$0xff]  ;;  %v621_v12 = vld [vmem:[%s926_s5 + $0x38] sm:$0xff] }
   0xa   :  { %v606_v11 = vld [vmem:[%s924_s3] sm:$0xff]  ;;  %253 = vmatpush.bf16.msra.mxu2 %v621_v12  ;;  %v620_v13 = vld [vmem:[%s926_s5 + $0x30] sm:$0xff]  ;;  %v619_v14 = vld [vmem:[%s926_s5 + $0x28] sm:$0xff] }
   0xb   :  { %90 = vmatpush.bf16.msra.mxu0 %v604_v2  ;;  %169 = vmatpush.bf16.msra.mxu1 %v612_v4  ;;  %v618_v15 = vld [vmem:[%s926_s5 + $0x20] sm:$0xff]  ;;  %v617_v16 = vld [vmem:[%s926_s5 + $0x18] sm:$0xff]  ;;  %v616_v17 = vld [vmem:[%s926_s5 + $0x10] sm:$0xff] }
   0xc   :  { %v641_v18 = vld [vmem:[%s923_s2] ss:$0 sm:$0xff]  ;;  %v615_v25 = vld [vmem:[%s926_s5 + $0x8] sm:$0xff]  ;;  %v629_v27 = vld [vmem:[%s928_s7 + $0x38] sm:$0xff] }
   0xd   :  { %v614_v26 = vld [vmem:[%s926_s5] sm:$0xff]  ;;  %v637_v28 = vld [vmem:[%s930_s9 + $0x38] sm:$0xff]  ;;  %338 = vmatpush.bf16.msra.mxu3 %v629_v27  ;;  %v628_v29 = vld [vmem:[%s928_s7 + $0x30] sm:$0xff] }
   0xe   :  { %475 = vmatmul.msk.bf16.vlgmr.msra.gmra.mxu0 %vm79_vm0, %v58_v5  ;;  %254 = vmatpush.bf16.msra.mxu2 %v620_v13  ;;  %v636_v30 = vld [vmem:[%s930_s9 + $0x30] sm:$0xff]  ;;  %v627_v31 = vld [vmem:[%s928_s7 + $0x28] sm:$0xff]  ;;  %v626_v33 = vld [vmem:[%s928_s7 + $0x20] sm:$0xff] }
   0xf   :  { %170 = vmatpush.bf16.msra.mxu1 %v611_v6  ;;  %419 = vmatpush.bf16.msrb.mxu0 %v637_v28  ;;  %v635_v32 = vld [vmem:[%s930_s9 + $0x28] sm:$0xff]  ;;  %v634_v34 = vld [vmem:[%s930_s9 + $0x20] sm:$0xff]  ;;  %v625_v35 = vld [vmem:[%s928_s7 + $0x18] sm:$0xff] }
  0x10   :  { %v633_v36 = vld [vmem:[%s930_s9 + $0x18] sm:$0xff]  ;;  %v624_v37 = vld [vmem:[%s928_s7 + $0x10] sm:$0xff]  ;;  %v642_v39 = vld [vmem:[%s925_s4] ss:$0 sm:$0xff] }
  0x11   :  { %339 = vmatpush.bf16.msra.mxu3 %v628_v29  ;;  %v632_v38 = vld [vmem:[%s930_s9 + $0x10] sm:$0xff]  ;;  %v623_v46 = vld [vmem:[%s928_s7 + $0x8] sm:$0xff]  ;;  %v622_v48 = vld [vmem:[%s928_s7] sm:$0xff] }
  0x12   :  { %255 = vmatpush.bf16.msra.mxu2 %v619_v14  ;;  %v631_v47 = vld [vmem:[%s930_s9 + $0x8] sm:$0xff]  ;;  %v630_v49 = vld [vmem:[%s930_s9] sm:$0xff]  ;;  %s725_s9 = smov [#allocation6]  }
  0x13   :  { %171 = vmatpush.bf16.msra.mxu1 %v610_v7  ;;  %420 = vmatpush.bf16.msrb.mxu0 %v636_v30  ;;  %v643_v50 = vld [vmem:[%s927_s6] ss:$0 sm:$0xff]  ;;  %s450_s3 = sshll.u32 %s725_s9, 4  ;;  %s451_s3 = int_to_ptr.vmem [resolvable:$true] %s450_s3 }
  0x14   :  { %v644_v57 = vld [vmem:[%s931_s10] ss:$0 sm:$0xff] }
  0x15   :  { %340 = vmatpush.bf16.msra.mxu3 %v627_v31  ;;  %v645_v60 = vld [vmem:[%s929_s8] ss:$0 sm:$0xff] }
  0x16   :  { %256 = vmatpush.bf16.msra.mxu2 %v618_v15 }
  0x17   :  { %172 = vmatpush.bf16.msra.mxu1 %v609_v8  ;;  %421 = vmatpush.bf16.msrb.mxu0 %v635_v32 }
  0x19   :  { %341 = vmatpush.bf16.msra.mxu3 %v626_v33 }
  0x1a   :  { %257 = vmatpush.bf16.msra.mxu2 %v617_v16 }
  0x1b   :  { %173 = vmatpush.bf16.msra.mxu1 %v608_v9  ;;  %422 = vmatpush.bf16.msrb.mxu0 %v634_v34 }
  0x1d   :  { %342 = vmatpush.bf16.msra.mxu3 %v625_v35 }
  0x1e   :  { %258 = vmatpush.bf16.msra.mxu2 %v616_v17 }
  0x1f   :  { %174 = vmatpush.bf16.msra.mxu1 %v607_v10  ;;  %423 = vmatpush.bf16.msrb.mxu0 %v633_v36 }
  0x21   :  { %343 = vmatpush.bf16.msra.mxu3 %v624_v37 }
  0x22   :  { %259 = vmatpush.bf16.msra.mxu2 %v615_v25 }
  0x23   :  { %175 = vmatpush.bf16.msra.mxu1 %v606_v11  ;;  %424 = vmatpush.bf16.msrb.mxu0 %v632_v38 }
  0x25   :  { %344 = vmatpush.bf16.msra.mxu3 %v623_v46 }
  0x26   :  { %260 = vmatpush.bf16.msra.mxu2 %v614_v26 }
  0x27   :  { %425 = vmatpush.bf16.msrb.mxu0 %v631_v47 }
  0x29   :  { %345 = vmatpush.bf16.msra.mxu3 %v622_v48 }
  0x2b   :  { %426 = vmatpush.bf16.msrb.mxu0 %v630_v49 }
  0x8b   :  { %v92_v19 = vpop.f32.mrf.mxu0 }
  0x8c   :  { %v93_v20 = vadd.f32 %v641_v18, %v92_v19 }
  0x8e   :  { %v97_v21 = vmul.f32 0.2, %v93_v20  ;;  %vm96_vm1 = vcmp.gt.f32.partialorder %v93_v20, 0.0 }
  0x90   :  { %v98_v22 = vsel %vm96_vm1, %v93_v20, %v97_v21 }
  0x91   :  { %v99_v23 = vpack.c.bf16 %v98_v22, %v98_v22 }
  0x93   :  { %v94_v24 = vpop.f32.mrf.mxu0  ;;  %176 = vmatmul.bf16.vlgmr.msra.gmra.mxu1 %v99_v23 }
 0x110   :  { %v177_v40 = vpop.f32.mrf.mxu1 }
 0x111   :  { %v178_v41 = vadd.f32 %v642_v39, %v177_v40 }
 0x113   :  { %v182_v42 = vmul.f32 0.2, %v178_v41  ;;  %vm181_vm2 = vcmp.gt.f32.partialorder %v178_v41, 0.0 }
 0x115   :  { %v183_v43 = vsel %vm181_vm2, %v178_v41, %v182_v42 }
 0x116   :  { %v184_v44 = vpack.c.bf16 %v183_v43, %v183_v43 }
 0x118   :  { %v179_v45 = vpop.f32.mrf.mxu1  ;;  %261 = vmatmul.bf16.vlgmr.msra.gmra.mxu2 %v184_v44 }
 0x19b   :  { %v262_v51 = vpop.f32.mrf.mxu2 }
 0x19c   :  { %v263_v52 = vadd.f32 %v643_v50, %v262_v51 }
 0x19e   :  { %v267_v53 = vmul.f32 0.2, %v263_v52  ;;  %vm266_vm3 = vcmp.gt.f32.partialorder %v263_v52, 0.0 }
 0x1a0   :  { %v268_v54 = vsel %vm266_vm3, %v263_v52, %v267_v53 }
 0x1a1   :  { %v269_v55 = vpack.c.bf16 %v268_v54, %v268_v54 }
 0x1a3   :  { %v264_v56 = vpop.f32.mrf.mxu2  ;;  %346 = vmatmul.bf16.vlgmr.msra.gmra.mxu3 %v269_v55  ;;  %427 = vmatmul.bf16.vlgmr.msrb.gmra.mxu0 %v269_v55 }
 0x220   :  { %v428_v58 = vpop.f32.mrf.mxu0 }
 0x221   :  { %v429_v59 = vadd.f32 %v644_v57, %v428_v58 }
 0x223   :  { %433 = vst.msk [vmem:[#allocation6] sm:$0xff] %vm79_vm0, %v429_v59 }
 0x224   :  { %455 = dma.vmem_to_hbm [thread:$0]  %s451_s3, 128, %s453_s17, [#allocation7]  }
 0x226   :  { %v347_v61 = vpop.f32.mrf.mxu3 }
 0x227   :  { %v348_v62 = vadd.f32 %v645_v60, %v347_v61 }
 0x228   :  { %v430_v63 = vpop.f32.mrf.mxu0 }
 0x229   :  { %432 = vst.msk [vmem:[#allocation5] sm:$0xff] %vm79_vm0, %v348_v62 }
 0x22a   :  { %444 = dma.vmem_to_hbm [thread:$0]  %s440_s19, 128, %s442_s21, [#allocation4]  }
 0x22e   :  { %v349_v0 = vpop.f32.mrf.mxu3 }
 0x22f   :  { %720 = dma.done.wait [#allocation4], 128  }
 0x230   :  { %721 = vsyncadd [#allocation4], 4294967168 }
 0x231   :  { %722 = dma.done.wait [#allocation7], 128  }
 0x232   :  { %723 = vsyncadd [#allocation7], 4294967168 }
 0x233   :  { %464 = vsyncpa [#allocation3], 1 }
 0x234   :  { %465 = vsyncpa [#allocation4], 1 }
 0x235   :  { %466 = vsyncpa [#allocation7], 1 }

</bundles_post_ra>
